<compile_context>
chip_gen: v7x
topology: tpu7x:2x2x1
jax: 0.10.0
libtpu: 0.0.40
codegen_flags: <defaults>
</compile_context>

<pallas_src>
import jax
import jax.numpy as jnp
from jax.experimental import pallas as pl
from jax.experimental.pallas import tpu as pltpu

NEG_SLOPE = 0.01   # PyTorch nn.LeakyReLU default negative_slope
HID_PAD = 256      # hidden 200 padded to a multiple of 128 (MXU / lane friendly)
ACT_PAD = 8        # action dim padded to a sublane multiple (4 -> 8)


def _leaky_relu(x):
    # valid for 0 < slope < 1: max(x, slope*x) — pure VPU, no compare+select.
    return jnp.maximum(x, NEG_SLOPE * x)


def qnet_kernel(x_ref, w1_ref, w2_ref, w3_ref, b_ref, o_ref):
    """Fused 3-layer MLP on one feature-major tile.

    x_ref : [S, TB]            f32  (states, batch on lanes)
    w1_ref: [HID_PAD, S]       bf16
    w2_ref: [HID_PAD, HID_PAD] bf16
    w3_ref: [ACT_PAD, HID_PAD] bf16
    b_ref : [HID_PAD, 3]       f32  (columns: b1 | b2 | b3-padded)
    o_ref : [ACT_PAD, TB]      f32
    """
    x = x_ref[...].astype(jnp.bfloat16)                 # cast only at MXU input
    h1 = jnp.dot(w1_ref[...], x, preferred_element_type=jnp.float32)
    h1 = _leaky_relu(h1 + b_ref[:, 0:1])                # f32 bias add + activation
    h2 = jnp.dot(w2_ref[...], h1.astype(jnp.bfloat16),
                 preferred_element_type=jnp.float32)
    h2 = _leaky_relu(h2 + b_ref[:, 1:2])
    out = jnp.dot(w3_ref[...], h2.astype(jnp.bfloat16),
                  preferred_element_type=jnp.float32)
    o_ref[...] = (out + b_ref[0:ACT_PAD, 2:3]).astype(o_ref.dtype)


def pack_params(params):
    """Pad / pack PyTorch-layout parameters ([out, in] weights, [out] biases).

    Returns ((w1p, w2p, w3p, bpack), action_size).  Padding rows/cols are zero,
    so padded hidden units stay exactly 0 through LeakyReLU and padded output
    rows are exactly 0 (sliced off by the wrapper)."""
    w1, b1, w2, b2, w3, b3 = params
    H1, S = w1.shape
    H2 = w2.shape[0]
    A = w3.shape[0]
    assert H1 <= HID_PAD and H2 <= HID_PAD and A <= ACT_PAD

    bf = jnp.bfloat16
    w1p = jnp.zeros((HID_PAD, S), bf).at[:H1, :].set(w1.astype(bf))
    w2p = jnp.zeros((HID_PAD, HID_PAD), bf).at[:H2, :H1].set(w2.astype(bf))
    w3p = jnp.zeros((ACT_PAD, HID_PAD), bf).at[:A, :H2].set(w3.astype(bf))
    bpack = jnp.zeros((HID_PAD, 3), jnp.float32)
    bpack = bpack.at[:H1, 0].set(b1.reshape(-1))
    bpack = bpack.at[:H2, 1].set(b2.reshape(-1))
    bpack = bpack.at[:A, 2].set(b3.reshape(-1))
    return (w1p, w2p, w3p, bpack), A


def _cost(batch, state_size, weight_bytes):
    flops = 2 * batch * (state_size * HID_PAD + HID_PAD * HID_PAD + HID_PAD * ACT_PAD)
    bytes_accessed = weight_bytes + batch * (state_size + ACT_PAD) * 4
    return pl.CostEstimate(flops=flops, transcendentals=0,
                           bytes_accessed=bytes_accessed)


def qnetwork_forward(state, packed, action_size, *, batch_tile=512):
    """state: [B, state_size] f32 (batch-major, PyTorch convention).
    Returns [B, action_size] f32."""
    w1p, w2p, w3p, bpack = packed
    B, S = state.shape
    x = state.T  # [S, B]: feature-major -> lane-dense input and output slabs

    weight_bytes = (w1p.size + w2p.size + w3p.size) * 2 + bpack.size * 4

    if B <= batch_tile:
        # Acting / small-batch path: no grid, no pipeline machinery — every
        # operand is one whole-array VMEM-resident block.  The ~140 KB of bf16
        # weight DMA dominates; compute is negligible.
        vmem = pl.BlockSpec(memory_space=pltpu.MemorySpace.VMEM)
        out = pl.pallas_call(
            qnet_kernel,
            out_shape=jax.ShapeDtypeStruct((ACT_PAD, B), jnp.float32),
            in_specs=[vmem] * 5,
            out_specs=vmem,
            cost_estimate=_cost(B, S, weight_bytes),
        )(x, w1p, w2p, w3p, bpack)
    else:
        # Training-minibatch path: tile the batch (lane) axis.  Weights and
        # biases use a constant index_map so they stay VMEM-resident (no
        # re-DMA).  Partial last block is masked by Pallas — no explicit pad.
        TB = batch_tile
        out = pl.pallas_call(
            qnet_kernel,
            out_shape=jax.ShapeDtypeStruct((ACT_PAD, B), jnp.float32),
            grid=(pl.cdiv(B, TB),),
            in_specs=[
                pl.BlockSpec((S, TB), lambda i: (0, i)),
                pl.BlockSpec((HID_PAD, S), lambda i: (0, 0)),
                pl.BlockSpec((HID_PAD, HID_PAD), lambda i: (0, 0)),
                pl.BlockSpec((ACT_PAD, HID_PAD), lambda i: (0, 0)),
                pl.BlockSpec((HID_PAD, 3), lambda i: (0, 0)),
            ],
            out_specs=pl.BlockSpec((ACT_PAD, TB), lambda i: (0, i)),
            compiler_params=pltpu.CompilerParams(
                dimension_semantics=("parallel",)),  # dual-TC sharding on v7x
            cost_estimate=_cost(B, S, weight_bytes),
        )(x, w1p, w2p, w3p, bpack)

    return out[:action_size, :].T


def init_params(key, state_size, hidden, action_size):
    """PyTorch nn.Linear-style init: W[out, in], b[out] ~ U(-1/sqrt(fan_in), +)."""
    def linear(k, fan_in, fan_out):
        kw, kb = jax.random.split(k)
        bound = float(1.0 / (fan_in ** 0.5))
        w = jax.random.uniform(kw, (fan_out, fan_in), jnp.float32, -bound, bound)
        b = jax.random.uniform(kb, (fan_out,), jnp.float32, -bound, bound)
        return w, b

    k1, k2, k3 = jax.random.split(key, 3)
    w1, b1 = linear(k1, state_size, hidden)
    w2, b2 = linear(k2, hidden, hidden)
    w3, b3 = linear(k3, hidden, action_size)
    return (w1, b1, w2, b2, w3, b3)


def qnetwork_ref_f32(state, params):
    """Pure-JAX f32 reference (exact PyTorch forward semantics)."""
    w1, b1, w2, b2, w3, b3 = params
    h = jax.nn.leaky_relu(state @ w1.T + b1, NEG_SLOPE)
    h = jax.nn.leaky_relu(h @ w2.T + b2, NEG_SLOPE)
    return h @ w3.T + b3


def qnetwork_ref_bf16(state, params):
    """Pure-JAX reference replicating the kernel numerics: bf16 MXU inputs,
    f32 accumulation, f32 bias add + LeakyReLU."""
    w1, b1, w2, b2, w3, b3 = params
    bf = jnp.bfloat16
    h = jnp.dot(state.astype(bf), w1.astype(bf).T, preferred_element_type=jnp.float32)
    h = jax.nn.leaky_relu(h + b1, NEG_SLOPE)
    h = jnp.dot(h.astype(bf), w2.astype(bf).T, preferred_element_type=jnp.float32)
    h = jax.nn.leaky_relu(h + b2, NEG_SLOPE)
    return jnp.dot(h.astype(bf), w3.astype(bf).T, preferred_element_type=jnp.float32) + b3


if __name__ == "__main__":
    STATE_SIZE = 8     # LunarLander-v2 observation dim
    ACTION_SIZE = 4    # LunarLander-v2 action dim
    HIDDEN = 200

    key = jax.random.PRNGKey(0)
    k_params, k_small, k_big, k_rag = jax.random.split(key, 4)
    params = init_params(k_params, STATE_SIZE, HIDDEN, ACTION_SIZE)
    packed, act = pack_params(params)

    # 1) Small-batch (acting) path: whole-array VMEM, no grid.
    small = jax.random.normal(k_small, (8, STATE_SIZE), jnp.float32)
    out_small = jax.block_until_ready(qnetwork_forward(small, packed, act))
    assert out_small.shape == (8, ACTION_SIZE)
    assert jnp.allclose(out_small, qnetwork_ref_bf16(small, params), atol=1e-3, rtol=1e-3)
    assert jnp.allclose(out_small, qnetwork_ref_f32(small, params), atol=5e-2, rtol=5e-2)

    # 2) Batch-tiled training path, grid length 2 (feeds both TCs on v7x).
    big = jax.random.normal(k_big, (1024, STATE_SIZE), jnp.float32)
    out_big = jax.block_until_ready(qnetwork_forward(big, packed, act, batch_tile=512))
    assert out_big.shape == (1024, ACTION_SIZE)
    assert jnp.allclose(out_big, qnetwork_ref_bf16(big, params), atol=1e-3, rtol=1e-3)

    # 3) Non-divisible batch: partial last block handled via masked writeback.
    ragged = jax.random.normal(k_rag, (600, STATE_SIZE), jnp.float32)
    out_rag = jax.block_until_ready(qnetwork_forward(ragged, packed, act, batch_tile=512))
    assert out_rag.shape == (600, ACTION_SIZE)
    assert jnp.allclose(out_rag, qnetwork_ref_bf16(ragged, params), atol=1e-3, rtol=1e-3)

    print("KERNEL_OK")
</pallas_src>

<mosaic_0001>
module attributes {stable_mosaic.version = 11 : i64} {
  func.func @qnet_kernel(%arg0: memref<8x8xf32, #tpu.memory_space<vmem>>, %arg1: memref<256x8xbf16, #tpu.memory_space<vmem>>, %arg2: memref<256x256xbf16, #tpu.memory_space<vmem>>, %arg3: memref<8x256xbf16, #tpu.memory_space<vmem>>, %arg4: memref<256x3xf32, #tpu.memory_space<vmem>>, %arg5: memref<8x8xf32, #tpu.memory_space<vmem>>) attributes {dimension_semantics = [], scalar_prefetch = 0 : i64, scratch_operands = 0 : i64, tpu.core_type = #tpu.core_type<tc>} {
    %c0 = arith.constant 0 : index
    %c0_0 = arith.constant 0 : index
    %0 = vector.load %arg0[%c0, %c0_0] : memref<8x8xf32, #tpu.memory_space<vmem>>, vector<8x8xf32>
    %1 = arith.truncf %0 : vector<8x8xf32> to vector<8x8xbf16>
    %c0_1 = arith.constant 0 : index
    %c0_2 = arith.constant 0 : index
    %2 = vector.load %arg1[%c0_1, %c0_2] : memref<256x8xbf16, #tpu.memory_space<vmem>>, vector<256x8xbf16>
    %cst = arith.constant dense<0.000000e+00> : vector<256x8xf32>
    %3 = tpu.matmul %2, %1, %cst {dimension_numbers = #tpu.dot_dimension_numbers<[1], [0], [0], [1], [0, 0, 1, 1], [], []>} : vector<256x8xbf16>, vector<8x8xbf16>, vector<256x8xf32> -> vector<256x8xf32>
    %c0_3 = arith.constant 0 : index
    %c0_4 = arith.constant 0 : index
    %4 = vector.load %arg4[%c0_3, %c0_4] : memref<256x3xf32, #tpu.memory_space<vmem>>, vector<256x1xf32>
    %5 = vector.broadcast %4 : vector<256x1xf32> to vector<256x8xf32>
    %6 = arith.addf %3, %5 : vector<256x8xf32>
    %cst_5 = arith.constant 0.00999999977 : f32
    %7 = vector.broadcast %cst_5 : f32 to vector<256x8xf32>
    %8 = arith.mulf %7, %6 : vector<256x8xf32>
    %9 = arith.maximumf %6, %8 : vector<256x8xf32>
    %c0_6 = arith.constant 0 : index
    %c0_7 = arith.constant 0 : index
    %10 = vector.load %arg2[%c0_6, %c0_7] : memref<256x256xbf16, #tpu.memory_space<vmem>>, vector<256x256xbf16>
    %11 = arith.truncf %9 : vector<256x8xf32> to vector<256x8xbf16>
    %cst_8 = arith.constant dense<0.000000e+00> : vector<256x8xf32>
    %12 = tpu.matmul %10, %11, %cst_8 {dimension_numbers = #tpu.dot_dimension_numbers<[1], [0], [0], [1], [0, 0, 1, 1], [], []>} : vector<256x256xbf16>, vector<256x8xbf16>, vector<256x8xf32> -> vector<256x8xf32>
    %c0_9 = arith.constant 0 : index
    %c1 = arith.constant 1 : index
    %13 = vector.load %arg4[%c0_9, %c1] : memref<256x3xf32, #tpu.memory_space<vmem>>, vector<256x1xf32>
    %14 = vector.broadcast %13 : vector<256x1xf32> to vector<256x8xf32>
    %15 = arith.addf %12, %14 : vector<256x8xf32>
    %cst_10 = arith.constant 0.00999999977 : f32
    %16 = vector.broadcast %cst_10 : f32 to vector<256x8xf32>
    %17 = arith.mulf %16, %15 : vector<256x8xf32>
    %18 = arith.maximumf %15, %17 : vector<256x8xf32>
    %c0_11 = arith.constant 0 : index
    %c0_12 = arith.constant 0 : index
    %19 = vector.load %arg3[%c0_11, %c0_12] : memref<8x256xbf16, #tpu.memory_space<vmem>>, vector<8x256xbf16>
    %20 = arith.truncf %18 : vector<256x8xf32> to vector<256x8xbf16>
    %cst_13 = arith.constant dense<0.000000e+00> : vector<8x8xf32>
    %21 = tpu.matmul %19, %20, %cst_13 {dimension_numbers = #tpu.dot_dimension_numbers<[1], [0], [0], [1], [0, 0, 1, 1], [], []>} : vector<8x256xbf16>, vector<256x8xbf16>, vector<8x8xf32> -> vector<8x8xf32>
    %c0_14 = arith.constant 0 : index
    %c2 = arith.constant 2 : index
    %22 = vector.load %arg4[%c0_14, %c2] : memref<256x3xf32, #tpu.memory_space<vmem>>, vector<8x1xf32>
    %23 = vector.broadcast %22 : vector<8x1xf32> to vector<8x8xf32>
    %24 = arith.addf %21, %23 : vector<8x8xf32>
    %c0_15 = arith.constant 0 : index
    %c0_16 = arith.constant 0 : index
    %25 = vector.load %arg5[%c0_15, %c0_16] : memref<8x8xf32, #tpu.memory_space<vmem>>, vector<8x8xf32>
    tpu.vector_store %arg5[%c0_15, %c0_16], %24 {strides = array<i32>} : memref<8x8xf32, #tpu.memory_space<vmem>>, vector<8x8xf32>,
    return
  }
}

</mosaic_0001>

<bundles_post_ra>
// kernel: tpu_custom_call.1
= control target key start
LH: loop header
LB: loop body
LE: loop exit
PB: predicated region body
PF: predicated region fallthrough
CT: control target
= control target key end

     0   :  { %vm377_vm0 = vcmask 1043456   ;;  %vm328_vm1 = vcmask 64512   ;;  %v1620_v6 = vmov 0   ;;  %s2242_s0 = inlined_call_operand.vmem [shape: f32[8,8], index: 0, kind: input, shape index: {}]   ;;  %s2243_s1 = inlined_call_operand.vmem [shape: bf16[256,8], index: 1, kind: input, shape index: {}]   ;;  %s2244_s2 = inlined_call_operand.vmem [shape: bf16[256,256], index: 2, kind: input, shape index: {}]   ;;  %s2245_s3 = inlined_call_operand.vmem [shape: bf16[8,256], index: 3, kind: input, shape index: {}]   ;;  %s2246_s4 = inlined_call_operand.vmem [shape: f32[256,3], index: 4, kind: input, shape index: {}]   ;;  %s2247_s5 = inlined_call_operand.hbm [shape: f32[8,8], index: 5, kind: output, shape index: {}]  }
   0x1   :  { %v22_v0 = vld [vmem:[%s2242_s0] sm:$0xff]  ;;  %v1531_v4 = vld [vmem:[%s2243_s1 + $0x8] sm:$0xff]   ;;  %v1532_v5 = vld [vmem:[%s2243_s1 + $0x10] sm:$0xff]   ;;  %1525 = vset.pattern.permute.xlu1 %v1620_v6  ;;  %1524 = vset.pattern.permute.xlu0 %v1620_v6 }
   0x2   :  { %v23_v1 = vpack.c.bf16 %v22_v0, %v22_v0  ;;  %v1530_v2 = vld [vmem:[%s2243_s1] sm:$0xff]   ;;  %v1684_v9 = vld [vmem:[%s2246_s4 + $0x88] sm:$0xff]  ;;  %v1533_v11 = vld [vmem:[%s2243_s1 + $0x18] sm:$0xff]  }
   0x3   :  { %1471 = vmatprep.mubr.msk.bf16.mxu0 %vm328_vm1, %v1530_v2  ;;  %v1672_v7 = vld [vmem:[%s2246_s4 + $0x80] sm:$0xff]  ;;  %v1689_v10 = vld [vmem:[%s2246_s4 + $0x8] sm:$0xff]  ;;  %v1702_v13 = vld [vmem:[%s2246_s4 + $0x90] sm:$0xff] }
   0x4   :  { %1519 = vmatprep.subr.msk.bf16.mxu0 %vm377_vm0, %v23_v1  ;;  %v379_v3 = vsel %vm377_vm0, %v23_v1, 0  ;;  %v1677_v8 = vld [vmem:[%s2246_s4] sm:$0xff]  ;;  %170 = vperm.xlu0 %1524, %v1672_v7   ;;  %v1707_v14 = vld [vmem:[%s2246_s4 + $0x98] sm:$0xff]  ;;  %v1716_v15 = vld [vmem:[%s2246_s4 + $0x10] sm:$0xff] }
   0x5   :  { %1470 = vmatpush3.bf16.msra.mxu0 %v379_v3  ;;  %90 = vperm.xlu1 %1525, %v1677_v8   ;;  %v1534_v12 = vld [vmem:[%s2243_s1 + $0x20] sm:$0xff]   ;;  %v1721_v16 = vld [vmem:[%s2246_s4 + $0x18] sm:$0xff]  ;;  %v1535_v17 = vld [vmem:[%s2243_s1 + $0x28] sm:$0xff]  }
   0x6   :  { %v1536_v18 = vld [vmem:[%s2243_s1 + $0x30] sm:$0xff]   ;;  %v1734_v19 = vld [vmem:[%s2246_s4 + $0xa0] sm:$0xff]  ;;  %v1739_v20 = vld [vmem:[%s2246_s4 + $0xa8] sm:$0xff] }
   0x7   :  { %v1537_v21 = vld [vmem:[%s2243_s1 + $0x38] sm:$0xff]   ;;  %v1538_v22 = vld [vmem:[%s2243_s1 + $0x40] sm:$0xff]   ;;  %v1759_v24 = vld [vmem:[%s2246_s4 + $0x28] sm:$0xff] }
   0x8   :  { %1472 = vmatmul.mubr.msk.bf16.vlgmr.msra.gmra.mrb[0].mxu0 %vm328_vm1, %v1531_v4  ;;  %175 = vperm.xlu0 %1524, %v1684_v9   ;;  %v1754_v23 = vld [vmem:[%s2246_s4 + $0x20] sm:$0xff]  ;;  %v1764_v25 = vld [vmem:[%s2246_s4 + $0xb0] sm:$0xff]  ;;  %v1769_v26 = vld [vmem:[%s2246_s4 + $0xb8] sm:$0xff] }
   0x9   :  { %1475 = vmatprep.mubr.msk.bf16.mxu0 %vm328_vm1, %v1532_v5  ;;  %95 = vperm.xlu1 %1525, %v1689_v10   ;;  %v1778_v27 = vld [vmem:[%s2246_s4 + $0x30] sm:$0xff]  ;;  %v1783_v28 = vld [vmem:[%s2246_s4 + $0x38] sm:$0xff]  ;;  %v1539_v29 = vld [vmem:[%s2243_s1 + $0x48] sm:$0xff]  }
   0xa   :  { %v1540_v30 = vld [vmem:[%s2243_s1 + $0x50] sm:$0xff]  }
   0xc   :  { %180 = vperm.xlu0 %1524, %v1702_v13  }
   0xd   :  { %185 = vperm.xlu1 %1525, %v1707_v14  }
  0x10   :  { %1476 = vmatmul.mubr.msk.bf16.gmra.mrb[4].mxu0 %vm328_vm1, %v1533_v11  ;;  %100 = vperm.xlu0 %1524, %v1716_v15  }
  0x11   :  { %1479 = vmatprep.mubr.msk.bf16.mxu0 %vm328_vm1, %v1534_v12  ;;  %105 = vperm.xlu1 %1525, %v1721_v16  }
  0x14   :  { %190 = vperm.xlu0 %1524, %v1734_v19  }
  0x15   :  { %195 = vperm.xlu1 %1525, %v1739_v20  }
  0x18   :  { %1480 = vmatmul.mubr.msk.bf16.gmra.mrb[8].mxu0 %vm328_vm1, %v1535_v17  ;;  %110 = vperm.xlu0 %1524, %v1754_v23  }
  0x19   :  { %1483 = vmatprep.mubr.msk.bf16.mxu0 %vm328_vm1, %v1536_v18  ;;  %115 = vperm.xlu1 %1525, %v1759_v24  }
  0x1c   :  { %200 = vperm.xlu0 %1524, %v1764_v25  }
  0x1d   :  { %205 = vperm.xlu1 %1525, %v1769_v26  }
  0x20   :  { %1484 = vmatmul.mubr.msk.bf16.gmra.mrb[12].mxu0 %vm328_vm1, %v1537_v21  ;;  %120 = vperm.xlu0 %1524, %v1778_v27  }
  0x21   :  { %1487 = vmatprep.mubr.msk.bf16.mxu0 %vm328_vm1, %v1538_v22  ;;  %125 = vperm.xlu1 %1525, %v1783_v28  }
  0x22   :  { %10 = vsyncpa [#allocation3], 0  ;;  %v1798_v31 = vld [vmem:[%s2246_s4 + $0xc0] sm:$0xff]  ;;  %v1803_v32 = vld [vmem:[%s2246_s4 + $0xc8] sm:$0xff]  ;;  %v1621_v17 = vmov 1  }
  0x23   :  { %v1812_v33 = vld [vmem:[%s2246_s4 + $0x40] sm:$0xff]  ;;  %v1817_v34 = vld [vmem:[%s2246_s4 + $0x48] sm:$0xff]  ;;  %v1541_v35 = vld [vmem:[%s2243_s1 + $0x58] sm:$0xff]  }
  0x24   :  { %210 = vperm.xlu0 %1524, %v1798_v31   ;;  %v1542_v36 = vld [vmem:[%s2243_s1 + $0x60] sm:$0xff]   ;;  %v1830_v37 = vld [vmem:[%s2246_s4 + $0xd0] sm:$0xff]  ;;  %v1835_v38 = vld [vmem:[%s2246_s4 + $0xd8] sm:$0xff] }
  0x25   :  { %215 = vperm.xlu1 %1525, %v1803_v32   ;;  %v1844_v39 = vld [vmem:[%s2246_s4 + $0x50] sm:$0xff]  ;;  %v1849_v40 = vld [vmem:[%s2246_s4 + $0x58] sm:$0xff]  ;;  %v1543_v41 = vld [vmem:[%s2243_s1 + $0x68] sm:$0xff]  }
  0x26   :  { %v1544_v42 = vld [vmem:[%s2243_s1 + $0x70] sm:$0xff]   ;;  %v1862_v43 = vld [vmem:[%s2246_s4 + $0xe0] sm:$0xff]  ;;  %v1867_v44 = vld [vmem:[%s2246_s4 + $0xe8] sm:$0xff] }
  0x27   :  { %v1876_v45 = vld [vmem:[%s2246_s4 + $0x60] sm:$0xff]  ;;  %v1881_v46 = vld [vmem:[%s2246_s4 + $0x68] sm:$0xff]  ;;  %v1545_v47 = vld [vmem:[%s2243_s1 + $0x78] sm:$0xff]  }
  0x28   :  { %1488 = vmatmul.mubr.msk.bf16.gmra.mrb[16].mxu0 %vm328_vm1, %v1539_v29  ;;  %130 = vperm.xlu0 %1524, %v1812_v33   ;;  %v1891_v48 = vld [vmem:[%s2246_s4 + $0xf0] sm:$0xff]  ;;  %v1896_v49 = vld [vmem:[%s2246_s4 + $0xf8] sm:$0xff]  ;;  %v1548_v56 = vld [vmem:[%s2244_s2 + $0x4] ss:$8 sps:$4 sm:$0xff]  }
  0x29   :  { %1491 = vmatprep.mubr.msk.bf16.mxu0 %vm328_vm1, %v1540_v30  ;;  %135 = vperm.xlu1 %1525, %v1817_v34   ;;  %v1904_v50 = vld [vmem:[%s2246_s4 + $0x70] sm:$0xff]  ;;  %v1909_v51 = vld [vmem:[%s2246_s4 + $0x78] sm:$0xff] }
  0x2a   :  { %v1551_v58 = vld [vmem:[%s2244_s2 + $0x54] ss:$8 sps:$4 sm:$0xff]  }
  0x2b   :  { %1014 = vmatprep.mubr.bf16.mxu1 %v1551_v58 }
  0x2c   :  { %220 = vperm.xlu0 %1524, %v1830_v37  }
  0x2d   :  { %225 = vperm.xlu1 %1525, %v1835_v38  }
  0x30   :  { %1492 = vmatmul.mubr.msk.bf16.gmra.mrb[20].mxu0 %vm328_vm1, %v1541_v35  ;;  %140 = vperm.xlu0 %1524, %v1844_v39  }
  0x31   :  { %1495 = vmatprep.mubr.msk.bf16.mxu0 %vm328_vm1, %v1542_v36  ;;  %145 = vperm.xlu1 %1525, %v1849_v40  }
  0x34   :  { %230 = vperm.xlu0 %1524, %v1862_v43  }
  0x35   :  { %235 = vperm.xlu1 %1525, %v1867_v44  }
  0x38   :  { %1496 = vmatmul.mubr.msk.bf16.gmra.mrb[24].mxu0 %vm328_vm1, %v1543_v41  ;;  %150 = vperm.xlu0 %1524, %v1876_v45  }
  0x39   :  { %1499 = vmatprep.mubr.msk.bf16.mxu0 %vm328_vm1, %v1544_v42  ;;  %155 = vperm.xlu1 %1525, %v1881_v46  }
  0x3c   :  { %240 = vperm.xlu0 %1524, %v1891_v48  }
  0x3d   :  { %245 = vperm.xlu1 %1525, %v1896_v49  }
  0x40   :  { %1500 = vmatmul.mubr.msk.bf16.gmra.mrb[28].mxu0 %vm328_vm1, %v1545_v47  ;;  %160 = vperm.xlu0 %1524, %v1904_v50  }
  0x41   :  { %165 = vperm.xlu1 %1525, %v1909_v51   ;;  %974 = vmatprep.mubr.bf16.mxu0 %v1548_v56 }
  0x44   :  { %1526 = vset.pattern.permute.xlu0 %v1621_v17 }
  0x45   :  { %1527 = vset.pattern.permute.xlu1 %v1621_v17  ;;  %719 = vperm.xlu0 %1526, %v1672_v7  }
  0x46   :  { %723 = vperm.xlu1 %1527, %v1684_v9  }
  0x49   :  { %659 = vperm.xlu0 %1526, %v1689_v10  }
  0x4a   :  { %655 = vperm.xlu1 %1527, %v1677_v8  }
  0x4d   :  { %731 = vperm.xlu0 %1526, %v1707_v14  }
  0x4e   :  { %727 = vperm.xlu1 %1527, %v1702_v13  }
  0x51   :  { %667 = vperm.xlu0 %1526, %v1721_v16  }
  0x52   :  { %663 = vperm.xlu1 %1527, %v1716_v15  }
  0x55   :  { %739 = vperm.xlu0 %1526, %v1739_v20  }
  0x56   :  { %735 = vperm.xlu1 %1527, %v1734_v19  }
  0x59   :  { %675 = vperm.xlu0 %1526, %v1759_v24  }
  0x5a   :  { %671 = vperm.xlu1 %1527, %v1754_v23  }
  0x5d   :  { %747 = vperm.xlu0 %1526, %v1769_v26  }
  0x5e   :  { %743 = vperm.xlu1 %1527, %v1764_v25  }
  0x61   :  { %683 = vperm.xlu0 %1526, %v1783_v28  }
  0x62   :  { %679 = vperm.xlu1 %1527, %v1778_v27  }
  0x65   :  { %755 = vperm.xlu0 %1526, %v1803_v32  }
  0x66   :  { %751 = vperm.xlu1 %1527, %v1798_v31  }
  0x69   :  { %691 = vperm.xlu0 %1526, %v1817_v34  }
  0x6a   :  { %687 = vperm.xlu1 %1527, %v1812_v33  }
  0x6d   :  { %763 = vperm.xlu0 %1526, %v1835_v38  }
  0x6e   :  { %759 = vperm.xlu1 %1527, %v1830_v37  }
  0x71   :  { %699 = vperm.xlu0 %1526, %v1849_v40  }
  0x72   :  { %695 = vperm.xlu1 %1527, %v1844_v39  }
  0x75   :  { %771 = vperm.xlu0 %1526, %v1867_v44  }
  0x76   :  { %767 = vperm.xlu1 %1527, %v1862_v43  }
  0x79   :  { %707 = vperm.xlu0 %1526, %v1881_v46  }
  0x7a   :  { %703 = vperm.xlu1 %1527, %v1876_v45  }
  0x7d   :  { %779 = vperm.xlu0 %1526, %v1896_v49  }
  0x7e   :  { %775 = vperm.xlu1 %1527, %v1891_v48  }
  0x81   :  { %715 = vperm.xlu0 %1526, %v1909_v51  }
  0x82   :  { %711 = vperm.xlu1 %1527, %v1904_v50  }
  0x83   :  { %v1913_v52 = vpop.permute.xlu0 %170 }
  0x84   :  { %v91_v53 = vpop.permute.xlu1 %90 }
  0x87   :  { %v1915_v54 = vpop.permute.xlu0 %175 }
  0x88   :  { %v96_v55 = vpop.permute.xlu1 %95 }
  0x8b   :  { %v1920_v57 = vpop.permute.xlu0 %180 }
  0x8c   :  { %v1925_v59 = vpop.permute.xlu1 %185 }
  0x8f   :  { %v101_v60 = vpop.permute.xlu0 %100 }
  0x90   :  { %v106_v61 = vpop.permute.xlu1 %105 }
  0x93   :  { %v1927_v62 = vpop.permute.xlu0 %190 }
  0x94   :  { %v1929_v63 = vpop.permute.xlu1 %195 }
  0x97   :  { %v111_v0 = vpop.permute.xlu0 %110 }
  0x98   :  { %v116_v1 = vpop.permute.xlu1 %115 }
  0x9b   :  { %v1931_v2 = vpop.permute.xlu0 %200 }
  0x9c   :  { %v1933_v3 = vpop.permute.xlu1 %205 }
  0x9f   :  { %v121_v4 = vpop.permute.xlu0 %120 }
  0xa0   :  { %v126_v5 = vpop.permute.xlu1 %125 }
  0xa3   :  { %v1935_v6 = vpop.permute.xlu0 %210 }
  0xa4   :  { %v1937_v11 = vpop.permute.xlu1 %215 }
  0xa7   :  { %v1939_v12 = vpop.permute.xlu0 %130 }
  0xa8   :  { %v1941_v18 = vpop.permute.xlu1 %135 }
  0xab   :  { %v1945_v21 = vpop.permute.xlu0 %220 }
  0xac   :  { %v1949_v22 = vpop.permute.xlu1 %225 }
  0xaf   :  { %v141_v29 = vpop.permute.xlu0 %140 }
  0xb0   :  { %v146_v41 = vpop.permute.xlu1 %145 }
  0xb3   :  { %v1955_v13 = vpop.permute.xlu0 %230 }
  0xb4   :  { %2248 = vst [vmem:[#allocation5_spill] sm:$0xff] %v1955_v13  ;;  %v1959_v17 = vpop.permute.xlu1 %235 }
  0xdb   :  { %v1473_v30 = vpop.f32.mrb[0].mxu0 }
  0xdc   :  { %v424_v35 = vadd.f32 %v1473_v30, %v101_v60  ;;  %v415_v36 = vpop.f32.mrb[1].mxu0 }
  0xdd   :  { %v416_v9 = vadd.f32 %v415_v36, %v91_v53  ;;  %v1474_v42 = vpop.f32.mrb[2].mxu0 }
  0xde   :  { %v544_v7 = vmul.f32 0.01, %v424_v35  ;;  %v427_v8 = vadd.f32 %v1474_v42, %v106_v61  ;;  %v418_v10 = vpop.f32.mrb[3].mxu0 }
  0xdf   :  { %v542_v47 = vmul.f32 0.01, %v416_v9  ;;  %v419_v56 = vadd.f32 %v418_v10, %v96_v55 }
  0xe0   :  { %v545_v58 = vmul.f32 0.01, %v427_v8  ;;  %v576_v60 = vmax.f32 %v424_v35, %v544_v7  ;;  %v151_v7 = vpop.permute.xlu0 %150 }
  0xe1   :  { %v543_v14 = vmul.f32 0.01, %v419_v56  ;;  %v574_v15 = vmax.f32 %v416_v9, %v542_v47 }
  0xe2   :  { %v577_v53 = vmax.f32 %v427_v8, %v545_v58 }
  0xe3   :  { %v575_v30 = vmax.f32 %v419_v56, %v543_v14  ;;  %v1477_v16 = vpop.f32.mrb[4].mxu0  ;;  %v156_v56 = vpop.permute.xlu1 %155 }
  0xe4   :  { %v1961_v36 = vpack.c.bf16 %v577_v53, %v576_v60  ;;  %v440_v61 = vadd.f32 %v1477_v16, %v121_v4  ;;  %v431_v42 = vpop.f32.mrb[5].mxu0 }
  0xe5   :  { %v1963_v55 = vpack.c.bf16 %v575_v30, %v574_v15  ;;  %v432_v10 = vadd.f32 %v431_v42, %v111_v0  ;;  %v1478_v13 = vpop.f32.mrb[6].mxu0 }
  0xe6   :  { %v548_v19 = vmul.f32 0.01, %v440_v61  ;;  %v443_v20 = vadd.f32 %v1478_v13, %v126_v5  ;;  %v434_v35 = vpop.f32.mrb[7].mxu0  ;;  %v1971_v13 = vpop.permute.xlu0 %240 }
  0xe7   :  { %v546_v8 = vmul.f32 0.01, %v432_v10  ;;  %v435_v9 = vadd.f32 %v434_v35, %v116_v1 }
  0xe8   :  { %v549_v47 = vmul.f32 0.01, %v443_v20  ;;  %v580_v4 = vmax.f32 %v440_v61, %v548_v19  ;;  %v1978_v61 = vpop.permute.xlu1 %245 }
  0xe9   :  { %v547_v58 = vmul.f32 0.01, %v435_v9  ;;  %v578_v14 = vmax.f32 %v432_v10, %v546_v8 }
  0xea   :  { %v581_v0 = vmax.f32 %v443_v20, %v549_v47  ;;  %v161_v35 = vpop.permute.xlu0 %160 }
  0xeb   :  { %v579_v60 = vmax.f32 %v435_v9, %v547_v58  ;;  %v1481_v23 = vpop.f32.mrb[8].mxu0 }
  0xec   :  { %v1969_v53 = vpack.c.bf16 %v581_v0, %v580_v4  ;;  %v456_v24 = vadd.f32 %v1481_v23, %v141_v29  ;;  %v447_v5 = vpop.f32.mrb[9].mxu0  ;;  %v166_v58 = vpop.permute.xlu1 %165 }
  0xed   :  { %v1973_v15 = vpack.c.bf16 %v579_v60, %v578_v14  ;;  %v448_v1 = vadd.f32 %v447_v5, %v1939_v12  ;;  %v1482_v30 = vpop.f32.mrb[10].mxu0 }
  0xee   :  { %v552_v25 = vmul.f32 0.01, %v456_v24  ;;  %v459_v26 = vadd.f32 %v1482_v30, %v146_v41  ;;  %v450_v16 = vpop.f32.mrb[11].mxu0 }
  0xef   :  { %v550_v42 = vmul.f32 0.01, %v448_v1  ;;  %v451_v29 = vadd.f32 %v450_v16, %v1941_v18 }
  0xf0   :  { %v553_v10 = vmul.f32 0.01, %v459_v26  ;;  %v584_v12 = vmax.f32 %v456_v24, %v552_v25 }
  0xf1   :  { %v551_v19 = vmul.f32 0.01, %v451_v29  ;;  %v582_v27 = vmax.f32 %v448_v1, %v550_v42 }
  0xf2   :  { %v585_v20 = vmax.f32 %v459_v26, %v553_v10 }
  0xf3   :  { %v583_v8 = vmax.f32 %v451_v29, %v551_v19  ;;  %v1485_v28 = vpop.f32.mrb[12].mxu0 }
  0xf4   :  { %v1983_v9 = vpack.c.bf16 %v585_v20, %v584_v12  ;;  %v472_v41 = vadd.f32 %v1485_v28, %v161_v35  ;;  %v463_v47 = vpop.f32.mrb[13].mxu0 }
  0xf5   :  { %v1985_v4 = vpack.c.bf16 %v583_v8, %v582_v27  ;;  %v464_v18 = vadd.f32 %v463_v47, %v151_v7  ;;  %v1486_v0 = vpop.f32.mrb[14].mxu0 }
  0xf6   :  { %v556_v31 = vmul.f32 0.01, %v472_v41  ;;  %v475_v32 = vadd.f32 %v1486_v0, %v166_v58  ;;  %v466_v14 = vpop.f32.mrb[15].mxu0 }
  0xf7   :  { %v554_v60 = vmul.f32 0.01, %v464_v18  ;;  %v467_v23 = vadd.f32 %v466_v14, %v156_v56 }
  0xf8   :  { %v557_v24 = vmul.f32 0.01, %v475_v32  ;;  %v588_v1 = vmax.f32 %v472_v41, %v556_v31 }
  0xf9   :  { %v555_v5 = vmul.f32 0.01, %v467_v23  ;;  %v586_v25 = vmax.f32 %v464_v18, %v554_v60 }
  0xfa   :  { %v589_v30 = vmax.f32 %v475_v32, %v557_v24 }
  0xfb   :  { %v587_v7 = vmax.f32 %v467_v23, %v555_v5  ;;  %v1489_v26 = vpop.f32.mrb[16].mxu0 }
  0xfc   :  { %v1991_v16 = vpack.c.bf16 %v589_v30, %v588_v1  ;;  %v488_v33 = vadd.f32 %v1489_v26, %v1920_v57  ;;  %v479_v34 = vpop.f32.mrb[17].mxu0 }
  0xfd   :  { %v1994_v42 = vpack.c.bf16 %v587_v7, %v586_v25  ;;  %v480_v56 = vadd.f32 %v479_v34, %v1913_v52  ;;  %v1490_v29 = vpop.f32.mrb[18].mxu0 }
  0xfe   :  { %v560_v37 = vmul.f32 0.01, %v488_v33  ;;  %v491_v38 = vadd.f32 %v1490_v29, %v1925_v59  ;;  %v482_v10 = vpop.f32.mrb[19].mxu0 }
  0xff   :  { %v558_v19 = vmul.f32 0.01, %v480_v56  ;;  %v483_v12 = vadd.f32 %v482_v10, %v1915_v54 }
 0x100   :  { %v561_v20 = vmul.f32 0.01, %v491_v38  ;;  %v592_v57 = vmax.f32 %v488_v33, %v560_v37  ;;  %v2249_v33 = vld [vmem:[#allocation5_spill] sm:$0xff] }
 0x101   :  { %v559_v35 = vmul.f32 0.01, %v483_v12  ;;  %v590_v27 = vmax.f32 %v480_v56, %v558_v19 }
 0x102   :  { %v593_v52 = vmax.f32 %v491_v38, %v561_v20 }
 0x103   :  { %v591_v8 = vmax.f32 %v483_v12, %v559_v35  ;;  %v1493_v39 = vpop.f32.mrb[20].mxu0 }
 0x104   :  { %v504_v40 = vadd.f32 %v1493_v39, %v1931_v2  ;;  %v495_v28 = vpop.f32.mrb[21].mxu0  ;;  %v647_v41 = vpack.c.bf16 %v593_v52, %v592_v57  ;;  %v1549_v52 = vld [vmem:[%s2244_s2 + $0x50] ss:$8 sps:$4 sm:$0xff]   ;;  %v1560_v39 = vld [vmem:[%s2244_s2 + $0x74] ss:$8 sps:$4 sm:$0xff]  }
 0x105   :  { %v496_v59 = vadd.f32 %v495_v28, %v1927_v62  ;;  %v1494_v47 = vpop.f32.mrb[22].mxu0  ;;  %v646_v58 = vpack.c.bf16 %v591_v8, %v590_v27  ;;  %v1556_v27 = vld [vmem:[%s2244_s2 + $0x10] ss:$8 sps:$4 sm:$0xff]   ;;  %v1558_v8 = vld [vmem:[%s2244_s2 + $0x24] ss:$8 sps:$4 sm:$0xff]  }
 0x106   :  { %v564_v43 = vmul.f32 0.01, %v504_v40  ;;  %v507_v44 = vadd.f32 %v1494_v47, %v1933_v3  ;;  %v498_v54 = vpop.f32.mrb[23].mxu0  ;;  %v1563_v28 = vld [vmem:[%s2244_s2 + $0x70] ss:$8 sps:$4 sm:$0xff]  }
 0x107   :  { %v562_v18 = vmul.f32 0.01, %v496_v59  ;;  %v499_v0 = vadd.f32 %v498_v54, %v1929_v63  ;;  %1335 = vmatprep.subr.bf16.mxu0 %v646_v58  ;;  %1503 = vmatprep.subr.bf16.mxu1 %v646_v58  ;;  %v1568_v47 = vld [vmem:[%s2244_s2 + $0x30] ss:$8 sps:$4 sm:$0xff]   ;;  %v1569_v58 = vld [vmem:[%s2244_s2 + $0x80] ss:$8 sps:$4 sm:$0xff]  }
 0x108   :  { %v565_v2 = vmul.f32 0.01, %v507_v44  ;;  %1336 = vmatpush3.bf16.msra.mxu0 %v1963_v55  ;;  %1511 = vmatpush3.bf16.msra.mxu1 %v1963_v55  ;;  %v596_v45 = vmax.f32 %v504_v40, %v564_v43  ;;  %v1562_v40 = vld [vmem:[%s2244_s2 + $0x20] ss:$8 sps:$4 sm:$0xff]   ;;  %v1570_v43 = vld [vmem:[%s2244_s2 + $0x44] ss:$8 sps:$4 sm:$0xff]  }
 0x109   :  { %v563_v62 = vmul.f32 0.01, %v499_v0  ;;  %1337 = vmatprep.subr.bf16.mxu0 %v647_v41  ;;  %1504 = vmatprep.subr.bf16.mxu1 %v647_v41  ;;  %v594_v46 = vmax.f32 %v496_v59, %v562_v18  ;;  %v1564_v41 = vld [vmem:[%s2244_s2 + $0x34] ss:$8 sps:$4 sm:$0xff]   ;;  %v1566_v59 = vld [vmem:[%s2244_s2 + $0x84] ss:$8 sps:$4 sm:$0xff]  }
 0x10a   :  { %v597_v31 = vmax.f32 %v507_v44, %v565_v2  ;;  %v1572_v44 = vld [vmem:[%s2244_s2 + $0x94] ss:$8 sps:$4 sm:$0xff]   ;;  %v1574_v54 = vld [vmem:[%s2244_s2 + $0x40] ss:$8 sps:$4 sm:$0xff]   ;;  %v1575_v18 = vld [vmem:[%s2244_s2 + $0x90] ss:$8 sps:$4 sm:$0xff]  }
 0x10b   :  { %v595_v3 = vmax.f32 %v499_v0, %v563_v62  ;;  %v1497_v32 = vpop.f32.mrb[24].mxu0  ;;  %v1576_v0 = vld [vmem:[%s2244_s2 + $0xa4] ss:$8 sps:$4 sm:$0xff]   ;;  %v1578_v2 = vld [vmem:[%s2244_s2 + $0xa0] ss:$8 sps:$4 sm:$0xff]  }
 0x10c   :  { %v520_v63 = vadd.f32 %v1497_v32, %v1945_v21  ;;  %v511_v14 = vpop.f32.mrb[25].mxu0  ;;  %1338 = vmatpush3.bf16.msra.mxu0 %v1961_v36  ;;  %1512 = vmatpush3.bf16.msra.mxu1 %v1961_v36  ;;  %v649_v55 = vpack.c.bf16 %v597_v31, %v596_v45  ;;  %v1579_v62 = vld [vmem:[%s2244_s2 + $0xb4] ss:$8 sps:$4 sm:$0xff]   ;;  %v1581_v45 = vld [vmem:[%s2244_s2 + $0xb0] ss:$8 sps:$4 sm:$0xff]  }
 0x10d   :  { %v512_v60 = vadd.f32 %v511_v14, %v1935_v6  ;;  %v1498_v23 = vpop.f32.mrb[26].mxu0  ;;  %v648_v24 = vpack.c.bf16 %v595_v3, %v594_v46  ;;  %v1582_v31 = vld [vmem:[%s2244_s2 + $0xc4] ss:$8 sps:$4 sm:$0xff]   ;;  %v1584_v46 = vld [vmem:[%s2244_s2 + $0xc0] ss:$8 sps:$4 sm:$0xff]  }
 0x10e   :  { %v568_v5 = vmul.f32 0.01, %v520_v63  ;;  %v523_v48 = vadd.f32 %v1498_v23, %v1949_v22  ;;  %v514_v1 = vpop.f32.mrb[27].mxu0  ;;  %v1585_v3 = vld [vmem:[%s2244_s2 + $0xd4] ss:$8 sps:$4 sm:$0xff]   ;;  %v2127_v23 = vpop.permute.xlu1 %723 }
 0x10f   :  { %v566_v49 = vmul.f32 0.01, %v512_v60  ;;  %v515_v21 = vadd.f32 %v514_v1, %v1937_v11  ;;  %1339 = vmatprep.subr.bf16.mxu0 %v648_v24  ;;  %1505 = vmatprep.subr.bf16.mxu1 %v648_v24  ;;  %v1587_v32 = vld [vmem:[%s2244_s2 + $0xd0] ss:$8 sps:$4 sm:$0xff]   ;;  %v1590_v14 = vld [vmem:[%s2244_s2 + $0xe0] ss:$8 sps:$4 sm:$0xff]   ;;  %v2129_v24 = vpop.permute.xlu0 %719 }
 0x110   :  { %v569_v30 = vmul.f32 0.01, %v523_v48  ;;  %1340 = vmatpush3.bf16.msra.mxu0 %v1973_v15  ;;  %1513 = vmatpush3.bf16.msra.mxu1 %v1973_v15  ;;  %v600_v36 = vmax.f32 %v520_v63, %v568_v5  ;;  %v1588_v63 = vld [vmem:[%s2244_s2 + $0xe4] ss:$8 sps:$4 sm:$0xff]  }
 0x111   :  { %v567_v6 = vmul.f32 0.01, %v515_v21  ;;  %1341 = vmatprep.subr.bf16.mxu0 %v649_v55  ;;  %1506 = vmatprep.subr.bf16.mxu1 %v649_v55  ;;  %v598_v25 = vmax.f32 %v512_v60, %v566_v49  ;;  %v1591_v55 = vld [vmem:[%s2244_s2 + $0xf4] ss:$8 sps:$4 sm:$0xff]   ;;  %v1593_v60 = vld [vmem:[%s2244_s2 + $0xf0] ss:$8 sps:$4 sm:$0xff]  }
 0x112   :  { %v601_v22 = vmax.f32 %v523_v48, %v569_v30  ;;  %v656_v5 = vpop.permute.xlu1 %655 }
 0x113   :  { %v599_v7 = vmax.f32 %v515_v21, %v567_v6  ;;  %v1501_v50 = vpop.f32.mrb[28].mxu0  ;;  %v660_v48 = vpop.permute.xlu0 %659 }
 0x114   :  { %v536_v51 = vadd.f32 %v1501_v50, %v1971_v13  ;;  %v527_v26 = vpop.f32.mrb[29].mxu0  ;;  %1342 = vmatpush3.bf16.msra.mxu0 %v1969_v53  ;;  %1514 = vmatpush3.bf16.msra.mxu1 %v1969_v53  ;;  %v651_v11 = vpack.c.bf16 %v601_v22, %v600_v36 }
 0x115   :  { %v528_v34 = vadd.f32 %v527_v26, %v2249_v33  ;;  %v1502_v56 = vpop.f32.mrb[30].mxu0  ;;  %v650_v15 = vpack.c.bf16 %v599_v7, %v598_v25 }
 0x116   :  { %v572_v29 = vmul.f32 0.01, %v536_v51  ;;  %v539_v37 = vadd.f32 %v1502_v56, %v1978_v61  ;;  %v530_v38 = vpop.f32.mrb[31].mxu0  ;;  %v2131_v1 = vpop.permute.xlu1 %727 }
 0x117   :  { %v570_v10 = vmul.f32 0.01, %v528_v34  ;;  %v531_v19 = vadd.f32 %v530_v38, %v1959_v17  ;;  %1343 = vmatprep.subr.bf16.mxu0 %v650_v15  ;;  %1507 = vmatprep.subr.bf16.mxu1 %v650_v15  ;;  %v2133_v49 = vpop.permute.xlu0 %731  ;;  %v1184_v15 = vld [vmem:[%s2246_s4] sm:$0xff] }
 0x118   :  { %v573_v13 = vmul.f32 0.01, %v539_v37  ;;  %1344 = vmatpush3.bf16.msra.mxu0 %v1985_v4  ;;  %1515 = vmatpush3.bf16.msra.mxu1 %v1985_v4  ;;  %v604_v12 = vmax.f32 %v536_v51, %v572_v29  ;;  %v1546_v4 = vld [vmem:[%s2244_s2] ss:$8 sps:$4 sm:$0xff]   ;;  %v1622_v29 = vmov 2  }
 0x119   :  { %v571_v53 = vmul.f32 0.01, %v531_v19  ;;  %1345 = vmatprep.subr.bf16.mxu0 %v651_v11  ;;  %1508 = vmatprep.subr.bf16.mxu1 %v651_v11  ;;  %v602_v35 = vmax.f32 %v528_v34, %v570_v10  ;;  %v2158_v11 = vld [vmem:[%s2245_s3] sm:$0xff]  ;;  %s1623_s3 = smov [#allocation2]  }
 0x11a   :  { %v605_v20 = vmax.f32 %v539_v37, %v573_v13  ;;  %v2135_v21 = vpop.permute.xlu1 %663  ;;  %v1317_v33 = vcombine.high %v2158_v11, %v2158_v11  ;;  %1528 = vset.pattern.permute.xlu1 %v1622_v29  ;;  %1529 = vset.pattern.permute.xlu0 %v1622_v29  ;;  %s1244_s4 = sshll.u32 %s1623_s3, 4  ;;  %s1245_s4 = int_to_ptr.vmem [resolvable:$true] %s1244_s4 }
 0x11b   :  { %v603_v57 = vmax.f32 %v531_v19, %v571_v53  ;;  %v2137_v30 = vpop.permute.xlu0 %667  ;;  %1187 = vperm.xlu1 %1528, %v1184_v15   ;;  %s1596_s24 = scalar_lea.vmem %s1245_s4, 128  ;;  %p1601_p1 = scmp.lt.s32.totalorder %s1245_s4, %s1245_s4 }
 0x11c   :  { %1346 = vmatpush3.bf16.msra.mxu0 %v1983_v9  ;;  %1516 = vmatpush3.bf16.msra.mxu1 %v1983_v9  ;;  %v653_v61 = vpack.c.bf16 %v605_v20, %v604_v12  ;;  %v1552_v9 = vld [vmem:[%s2244_s2 + $0x14] ss:$8 sps:$4 sm:$0xff]   ;;  %p1597_p0 = scmp.ne.s32.totalorder %s1245_s4, %s1596_s24  ;;  %p1602_p2 = scmp.lt.s32.totalorder %s1596_s24, %s1596_s24 }
 0x11d   :  { %v652_v17 = vpack.c.bf16 %v603_v57, %v602_v35 }
 0x11e   :  { %v2139_v6 = vpop.permute.xlu1 %735  ;;  %p1603_p3 = por %p1602_p2, %p1601_p1 }
 0x11f   :  { %1347 = vmatprep.subr.bf16.mxu0 %v652_v17  ;;  %1509 = vmatprep.subr.bf16.mxu1 %v652_v17  ;;  %v2141_v36 = vpop.permute.xlu0 %739 }
 0x120   :  { %1348 = vmatpush3.bf16.msra.mxu0 %v1994_v42  ;;  %1517 = vmatpush3.bf16.msra.mxu1 %v1994_v42  ;;  %v1554_v42 = vld [vmem:[%s2244_s2 + $0x64] ss:$8 sps:$4 sm:$0xff]   ;;  %p1604_p4 = pnand %p1603_p3, %p1597_p0 }
 0x121   :  { %1349 = vmatprep.subr.bf16.mxu0 %v653_v61  ;;  %1510 = vmatprep.subr.bf16.mxu1 %v653_v61 }
 0x122   :  { %v2143_v22 = vpop.permute.xlu1 %671 }
 0x123   :  { %v2145_v25 = vpop.permute.xlu0 %675 }
 0x124   :  { %1350 = vmatpush3.bf16.msra.mxu0 %v1991_v16  ;;  %1518 = vmatpush3.bf16.msra.mxu1 %v1991_v16  ;;  %v1557_v16 = vld [vmem:[%s2244_s2 + $0x60] ss:$8 sps:$4 sm:$0xff]  }
 0x126   :  { %v2147_v7 = vpop.permute.xlu1 %743 }
 0x127   :  { %975 = vmatmul.mubr.bf16.vlgmr.msra.gmra.mrb[32].mxu0 %v1546_v4  ;;  %1015 = vmatmul.mubr.bf16.vlgmr.msra.gmra.mrb[0].mxu1 %v1549_v52  ;;  %v2149_v50 = vpop.permute.xlu0 %747 }
 0x128   :  { %982 = vmatprep.mubr.bf16.mxu0 %v1552_v9  ;;  %1022 = vmatprep.mubr.bf16.mxu1 %v1554_v42 }
 0x12a   :  { %v2151_v51 = vpop.permute.xlu1 %679 }
 0x12b   :  { %v2153_v26 = vpop.permute.xlu0 %683 }
 0x12e   :  { %v2162_v34 = vpop.permute.xlu1 %751 }
 0x12f   :  { %983 = vmatmul.mubr.bf16.gmra.mrb[36].mxu0 %v1556_v27  ;;  %1023 = vmatmul.mubr.bf16.gmra.mrb[4].mxu1 %v1557_v16  ;;  %v2164_v56 = vpop.permute.xlu0 %755 }
 0x130   :  { %990 = vmatprep.mubr.bf16.mxu0 %v1558_v8  ;;  %1030 = vmatprep.mubr.bf16.mxu1 %v1560_v39 }
 0x132   :  { %v2169_v37 = vpop.permute.xlu1 %687 }
 0x133   :  { %v2171_v38 = vpop.permute.xlu0 %691 }
 0x136   :  { %v2173_v10 = vpop.permute.xlu1 %759 }
 0x137   :  { %991 = vmatmul.mubr.bf16.gmra.mrb[40].mxu0 %v1562_v40  ;;  %1031 = vmatmul.mubr.bf16.gmra.mrb[8].mxu1 %v1563_v28  ;;  %v2175_v19 = vpop.permute.xlu0 %763 }
 0x138   :  { %998 = vmatprep.mubr.bf16.mxu0 %v1564_v41  ;;  %1038 = vmatprep.mubr.bf16.mxu1 %v1566_v59 }
 0x13a   :  { %v696_v13 = vpop.permute.xlu1 %695 }
 0x13b   :  { %v700_v53 = vpop.permute.xlu0 %699 }
 0x13e   :  { %v2177_v12 = vpop.permute.xlu1 %767 }
 0x13f   :  { %999 = vmatmul.mubr.bf16.gmra.mrb[44].mxu0 %v1568_v47  ;;  %1039 = vmatmul.mubr.bf16.gmra.mrb[12].mxu1 %v1569_v58  ;;  %v2179_v20 = vpop.permute.xlu0 %771 }
 0x140   :  { %1006 = vmatprep.mubr.bf16.mxu0 %v1570_v43  ;;  %1046 = vmatprep.mubr.bf16.mxu1 %v1572_v44 }
 0x142   :  { %v704_v35 = vpop.permute.xlu1 %703 }
 0x143   :  { %v708_v57 = vpop.permute.xlu0 %707 }
 0x147   :  { %1007 = vmatmul.mubr.bf16.gmra.mrb[48].mxu0 %v1574_v54  ;;  %1047 = vmatmul.mubr.bf16.gmra.mrb[16].mxu1 %v1575_v18  ;;  %v2181_v54 = vpop.permute.xlu1 %775  ;;  %v2183_v18 = vpop.permute.xlu0 %779 }
 0x148   :  { %1054 = vmatprep.mubr.bf16.mxu1 %v1576_v0  ;;  %1229 = vmatprep.mubr.bf16.mxu0 %v1317_v33 }
 0x14f   :  { %1055 = vmatmul.mubr.bf16.gmra.mrb[20].mxu1 %v1578_v2 }
 0x150   :  { %1062 = vmatprep.mubr.bf16.mxu1 %v1579_v62 }
 0x157   :  { %1063 = vmatmul.mubr.bf16.gmra.mrb[24].mxu1 %v1581_v45 }
 0x158   :  { %1070 = vmatprep.mubr.bf16.mxu1 %v1582_v31 }
 0x15f   :  { %1071 = vmatmul.mubr.bf16.gmra.mrb[28].mxu1 %v1584_v46 }
 0x160   :  { %1078 = vmatprep.mubr.bf16.mxu1 %v1585_v3 }
 0x167   :  { %1079 = vmatmul.mubr.bf16.gmra.mrb[32].mxu1 %v1587_v32 }
 0x168   :  { %1086 = vmatprep.mubr.bf16.mxu1 %v1588_v63 }
 0x16f   :  { %1087 = vmatmul.mubr.bf16.gmra.mrb[36].mxu1 %v1590_v14 }
 0x170   :  { %1094 = vmatprep.mubr.bf16.mxu1 %v1591_v55 }
 0x177   :  { %1095 = vmatmul.mubr.bf16.gmra.mrb[40].mxu1 %v1593_v60 }
 0x1fa   :  { %v1381_v61 = vpop.f32.mrb[0].mxu1  ;;  %v1351_v17 = vpop.f32.mrb[32].mxu0 }
 0x1fb   :  { %v1382_v4 = vpop.f32.mrb[1].mxu1  ;;  %v1352_v52 = vpop.f32.mrb[33].mxu0 }
 0x1fc   :  { %v1383_v9 = vadd.f32 %v1382_v4, %v1381_v61  ;;  %v1384_v42 = vpop.f32.mrb[2].mxu1  ;;  %v1353_v27 = vadd.f32 %v1352_v52, %v1351_v17  ;;  %v1354_v16 = vpop.f32.mrb[34].mxu0 }
 0x1fd   :  { %v1385_v8 = vpop.f32.mrb[3].mxu1  ;;  %v1355_v39 = vpop.f32.mrb[35].mxu0 }
 0x1fe   :  { %v1017_v40 = vadd.f32 %v1383_v9, %v696_v13  ;;  %v1386_v28 = vadd.f32 %v1385_v8, %v1384_v42  ;;  %v977_v41 = vadd.f32 %v1353_v27, %v656_v5  ;;  %v1356_v59 = vadd.f32 %v1355_v39, %v1354_v16  ;;  %v712_v16 = vpop.permute.xlu1 %711  ;;  %v716_v8 = vpop.permute.xlu0 %715 }
 0x200   :  { %v1113_v47 = vmul.f32 0.01, %v1017_v40  ;;  %v1020_v58 = vadd.f32 %v1386_v28, %v700_v53  ;;  %v1103_v43 = vmul.f32 0.01, %v977_v41  ;;  %v980_v44 = vadd.f32 %v1356_v59, %v660_v48 }
 0x202   :  { %v1114_v0 = vmul.f32 0.01, %v1020_v58  ;;  %v1387_v2 = vpop.f32.mrb[4].mxu1  ;;  %v1135_v62 = vmax.f32 %v977_v41, %v1103_v43  ;;  %v1104_v45 = vmul.f32 0.01, %v980_v44  ;;  %v1357_v31 = vpop.f32.mrb[36].mxu0  ;;  %v1145_v46 = vmax.f32 %v1017_v40, %v1113_v47 }
 0x203   :  { %v1388_v3 = vpop.f32.mrb[5].mxu1  ;;  %v1358_v32 = vpop.f32.mrb[37].mxu0 }
 0x204   :  { %v1146_v63 = vmax.f32 %v1020_v58, %v1114_v0  ;;  %v1389_v14 = vadd.f32 %v1388_v3, %v1387_v2  ;;  %v1390_v55 = vpop.f32.mrb[6].mxu1  ;;  %v1136_v60 = vmax.f32 %v980_v44, %v1104_v45  ;;  %v1359_v5 = vadd.f32 %v1358_v32, %v1357_v31  ;;  %v1360_v33 = vpop.f32.mrb[38].mxu0 }
 0x205   :  { %v1391_v15 = vpop.f32.mrb[7].mxu1  ;;  %v1361_v48 = vpop.f32.mrb[39].mxu0 }
 0x206   :  { %v2185_v29 = vpack.c.bf16 %v1146_v63, %v1145_v46  ;;  %v1025_v13 = vadd.f32 %v1389_v14, %v704_v35  ;;  %v1392_v53 = vadd.f32 %v1391_v15, %v1390_v55  ;;  %v2187_v61 = vpack.c.bf16 %v1136_v60, %v1135_v62 }
 0x207   :  { %v985_v17 = vadd.f32 %v1359_v5, %v2135_v21  ;;  %v1362_v4 = vadd.f32 %v1361_v48, %v1360_v33 }
 0x208   :  { %v1115_v52 = vmul.f32 0.01, %v1025_v13  ;;  %v1028_v9 = vadd.f32 %v1392_v53, %v708_v57 }
 0x209   :  { %v1105_v42 = vmul.f32 0.01, %v985_v17  ;;  %v988_v27 = vadd.f32 %v1362_v4, %v2137_v30 }
 0x20a   :  { %v1116_v39 = vmul.f32 0.01, %v1028_v9  ;;  %v1393_v40 = vpop.f32.mrb[8].mxu1  ;;  %v1363_v28 = vpop.f32.mrb[40].mxu0  ;;  %v1147_v58 = vmax.f32 %v1025_v13, %v1115_v52 }
 0x20b   :  { %v1137_v41 = vmax.f32 %v985_v17, %v1105_v42  ;;  %v1394_v59 = vpop.f32.mrb[9].mxu1  ;;  %v1106_v47 = vmul.f32 0.01, %v988_v27  ;;  %v1364_v35 = vpop.f32.mrb[41].mxu0 }
 0x20c   :  { %v1148_v43 = vmax.f32 %v1028_v9, %v1116_v39  ;;  %v1395_v44 = vadd.f32 %v1394_v59, %v1393_v40  ;;  %v1396_v0 = vpop.f32.mrb[10].mxu1  ;;  %v1365_v21 = vadd.f32 %v1364_v35, %v1363_v28  ;;  %v1366_v2 = vpop.f32.mrb[42].mxu0 }
 0x20d   :  { %v1138_v62 = vmax.f32 %v988_v27, %v1106_v47  ;;  %v1397_v57 = vpop.f32.mrb[11].mxu1  ;;  %v1367_v45 = vpop.f32.mrb[43].mxu0 }
 0x20e   :  { %v2191_v31 = vpack.c.bf16 %v1148_v43, %v1147_v58  ;;  %v1033_v30 = vadd.f32 %v1395_v44, %v712_v16  ;;  %v1398_v46 = vadd.f32 %v1397_v57, %v1396_v0  ;;  %v993_v3 = vadd.f32 %v1365_v21, %v2143_v22 }
 0x20f   :  { %v2194_v32 = vpack.c.bf16 %v1138_v62, %v1137_v41  ;;  %v1368_v63 = vadd.f32 %v1367_v45, %v1366_v2 }
 0x210   :  { %v1117_v14 = vmul.f32 0.01, %v1033_v30  ;;  %v1107_v55 = vmul.f32 0.01, %v993_v3  ;;  %v1036_v60 = vadd.f32 %v1398_v46, %v716_v8 }
 0x211   :  { %v996_v5 = vadd.f32 %v1368_v63, %v2145_v25 }
 0x212   :  { %v1118_v33 = vmul.f32 0.01, %v1036_v60  ;;  %v1369_v15 = vpop.f32.mrb[44].mxu0  ;;  %v1399_v48 = vpop.f32.mrb[12].mxu1  ;;  %v1139_v13 = vmax.f32 %v993_v3, %v1107_v55  ;;  %v1149_v52 = vmax.f32 %v1033_v30, %v1117_v14 }
 0x213   :  { %v1108_v53 = vmul.f32 0.01, %v996_v5  ;;  %v1370_v17 = vpop.f32.mrb[45].mxu0  ;;  %v1400_v4 = vpop.f32.mrb[13].mxu1 }
 0x214   :  { %v1150_v9 = vmax.f32 %v1036_v60, %v1118_v33  ;;  %v1371_v42 = vadd.f32 %v1370_v17, %v1369_v15  ;;  %v1401_v27 = vadd.f32 %v1400_v4, %v1399_v48  ;;  %v1372_v22 = vpop.f32.mrb[46].mxu0  ;;  %v1402_v16 = vpop.f32.mrb[14].mxu1 }
 0x215   :  { %v1140_v39 = vmax.f32 %v996_v5, %v1108_v53  ;;  %v1373_v40 = vpop.f32.mrb[47].mxu0  ;;  %v1403_v28 = vpop.f32.mrb[15].mxu1 }
 0x216   :  { %v2197_v41 = vpack.c.bf16 %v1150_v9, %v1149_v52  ;;  %v1001_v25 = vadd.f32 %v1371_v42, %v2151_v51  ;;  %v1041_v8 = vadd.f32 %v1401_v27, %v2129_v24  ;;  %v1374_v59 = vadd.f32 %v1373_v40, %v1372_v22 }
 0x217   :  { %v2201_v47 = vpack.c.bf16 %v1140_v39, %v1139_v13  ;;  %v1404_v35 = vadd.f32 %v1403_v28, %v1402_v16 }
 0x218   :  { %v1109_v58 = vmul.f32 0.01, %v1001_v25  ;;  %v1004_v43 = vadd.f32 %v1374_v59, %v2153_v26  ;;  %v1119_v44 = vmul.f32 0.01, %v1041_v8 }
 0x219   :  { %v1044_v0 = vadd.f32 %v1404_v35, %v2127_v23 }
 0x21a   :  { %v1110_v21 = vmul.f32 0.01, %v1004_v43  ;;  %v1375_v2 = vpop.f32.mrb[48].mxu0  ;;  %v1405_v62 = vpop.f32.mrb[16].mxu1  ;;  %v1141_v46 = vmax.f32 %v1001_v25, %v1109_v58  ;;  %v1151_v55 = vmax.f32 %v1041_v8, %v1119_v44 }
 0x21b   :  { %v1120_v57 = vmul.f32 0.01, %v1044_v0  ;;  %v1376_v45 = vpop.f32.mrb[49].mxu0  ;;  %v1406_v30 = vpop.f32.mrb[17].mxu1 }
 0x21c   :  { %v1142_v51 = vmax.f32 %v1004_v43, %v1110_v21  ;;  %v1377_v3 = vadd.f32 %v1376_v45, %v1375_v2  ;;  %v1407_v24 = vadd.f32 %v1406_v30, %v1405_v62  ;;  %v1378_v63 = vpop.f32.mrb[50].mxu0  ;;  %v1408_v14 = vpop.f32.mrb[18].mxu1 }
 0x21d   :  { %v1152_v60 = vmax.f32 %v1044_v0, %v1120_v57  ;;  %v1379_v5 = vpop.f32.mrb[51].mxu0  ;;  %v1409_v33 = vpop.f32.mrb[19].mxu1 }
 0x21e   :  { %v1171_v26 = vpack.c.bf16 %v1142_v51, %v1141_v46  ;;  %v1009_v15 = vadd.f32 %v1377_v3, %v2169_v37  ;;  %v1049_v23 = vadd.f32 %v1407_v24, %v2131_v1  ;;  %v1380_v48 = vadd.f32 %v1379_v5, %v1378_v63 }
 0x21f   :  { %v1410_v13 = vadd.f32 %v1409_v33, %v1408_v14  ;;  %v1176_v53 = vpack.c.bf16 %v1152_v60, %v1151_v55 }
 0x220   :  { %v1111_v17 = vmul.f32 0.01, %v1009_v15  ;;  %v1012_v4 = vadd.f32 %v1380_v48, %v2171_v38  ;;  %v1121_v52 = vmul.f32 0.01, %v1049_v23 }
 0x221   :  { %v1052_v9 = vadd.f32 %v1410_v13, %v2133_v49  ;;  %1447 = vmatprep.subr.bf16.mxu0 %v1176_v53 }
 0x222   :  { %v1112_v42 = vmul.f32 0.01, %v1012_v4  ;;  %1448 = vmatpush3.bf16.msra.mxu0 %v2187_v61  ;;  %v1411_v27 = vpop.f32.mrb[20].mxu1  ;;  %v1143_v39 = vmax.f32 %v1009_v15, %v1111_v17  ;;  %v1153_v28 = vmax.f32 %v1049_v23, %v1121_v52 }
 0x223   :  { %v1122_v22 = vmul.f32 0.01, %v1052_v9  ;;  %v1412_v16 = vpop.f32.mrb[21].mxu1 }
 0x224   :  { %v1144_v37 = vmax.f32 %v1012_v4, %v1112_v42  ;;  %v1413_v40 = vadd.f32 %v1412_v16, %v1411_v27  ;;  %v1414_v1 = vpop.f32.mrb[22].mxu1 }
 0x225   :  { %v1154_v25 = vmax.f32 %v1052_v9, %v1122_v22  ;;  %v1415_v8 = vpop.f32.mrb[23].mxu1 }
 0x226   :  { %v1172_v59 = vpack.c.bf16 %v1144_v37, %v1143_v39  ;;  %v1057_v38 = vadd.f32 %v1413_v40, %v2139_v6  ;;  %v1416_v35 = vadd.f32 %v1415_v8, %v1414_v1 }
 0x227   :  { %v1177_v58 = vpack.c.bf16 %v1154_v25, %v1153_v28 }
 0x228   :  { %v1123_v49 = vmul.f32 0.01, %v1057_v38  ;;  %v1060_v43 = vadd.f32 %v1416_v35, %v2141_v36 }
 0x229   :  { %1449 = vmatprep.subr.bf16.mxu0 %v1177_v58 }
 0x22a   :  { %v1124_v61 = vmul.f32 0.01, %v1060_v43  ;;  %1450 = vmatpush3.bf16.msra.mxu0 %v2194_v32  ;;  %v1417_v44 = vpop.f32.mrb[24].mxu1  ;;  %v1155_v21 = vmax.f32 %v1057_v38, %v1123_v49 }
 0x22b   :  { %v1418_v0 = vpop.f32.mrb[25].mxu1 }
 0x22c   :  { %v1156_v2 = vmax.f32 %v1060_v43, %v1124_v61  ;;  %v1419_v62 = vadd.f32 %v1418_v0, %v1417_v44  ;;  %v1420_v57 = vpop.f32.mrb[26].mxu1 }
 0x22d   :  { %v1421_v45 = vpop.f32.mrb[27].mxu1 }
 0x22e   :  { %v1065_v30 = vadd.f32 %v1419_v62, %v2147_v7  ;;  %v1422_v46 = vadd.f32 %v1421_v45, %v1420_v57  ;;  %v1178_v6 = vpack.c.bf16 %v1156_v2, %v1155_v21 }
 0x230   :  { %v1125_v51 = vmul.f32 0.01, %v1065_v30  ;;  %v1068_v3 = vadd.f32 %v1422_v46, %v2149_v50  ;;  %1451 = vmatprep.subr.bf16.mxu0 %v1178_v6  ;;  %v1316_v6 = vcombine.low %v2158_v11, %v2158_v11 }
 0x231   :  { %1452 = vmatpush3.bf16.msra.mxu0 %v2201_v47 }
 0x232   :  { %v1126_v36 = vmul.f32 0.01, %v1068_v3  ;;  %v1423_v24 = vpop.f32.mrb[28].mxu1  ;;  %v1157_v63 = vmax.f32 %v1065_v30, %v1125_v51 }
 0x233   :  { %v1424_v32 = vpop.f32.mrb[29].mxu1 }
 0x234   :  { %v1158_v14 = vmax.f32 %v1068_v3, %v1126_v36  ;;  %v1425_v55 = vadd.f32 %v1424_v32, %v1423_v24  ;;  %v1426_v60 = vpop.f32.mrb[30].mxu1  ;;  %v1188_v3 = vpop.permute.xlu1 %1187 }
 0x235   :  { %v1427_v5 = vpop.f32.mrb[31].mxu1 }
 0x236   :  { %v1073_v33 = vadd.f32 %v1425_v55, %v2162_v34  ;;  %v1428_v15 = vadd.f32 %v1427_v5, %v1426_v60  ;;  %v1179_v7 = vpack.c.bf16 %v1158_v14, %v1157_v63 }
 0x238   :  { %v1127_v23 = vmul.f32 0.01, %v1073_v33  ;;  %v1076_v48 = vadd.f32 %v1428_v15, %v2164_v56  ;;  %1453 = vmatprep.subr.bf16.mxu0 %v1179_v7 }
 0x239   :  { %1454 = vmatpush3.bf16.msra.mxu0 %v1171_v26 }
 0x23a   :  { %v1128_v50 = vmul.f32 0.01, %v1076_v48  ;;  %v1429_v13 = vpop.f32.mrb[32].mxu1  ;;  %v1159_v53 = vmax.f32 %v1073_v33, %v1127_v23 }
 0x23b   :  { %v1430_v47 = vpop.f32.mrb[33].mxu1 }
 0x23c   :  { %v1160_v17 = vmax.f32 %v1076_v48, %v1128_v50  ;;  %v1431_v4 = vadd.f32 %v1430_v47, %v1429_v13  ;;  %v1432_v52 = vpop.f32.mrb[34].mxu1 }
 0x23d   :  { %v1433_v9 = vpop.f32.mrb[35].mxu1 }
 0x23e   :  { %v1081_v42 = vadd.f32 %v1431_v4, %v2173_v10  ;;  %v1434_v27 = vadd.f32 %v1433_v9, %v1432_v52  ;;  %v1180_v22 = vpack.c.bf16 %v1160_v17, %v1159_v53 }
 0x240   :  { %v1129_v34 = vmul.f32 0.01, %v1081_v42  ;;  %v1084_v16 = vadd.f32 %v1434_v27, %v2175_v19  ;;  %1455 = vmatprep.subr.bf16.mxu0 %v1180_v22 }
 0x241   :  { %1456 = vmatpush3.bf16.msra.mxu0 %v1172_v59 }
 0x242   :  { %v1130_v56 = vmul.f32 0.01, %v1084_v16  ;;  %v1435_v39 = vpop.f32.mrb[36].mxu1  ;;  %v1161_v37 = vmax.f32 %v1081_v42, %v1129_v34 }
 0x243   :  { %v1436_v26 = vpop.f32.mrb[37].mxu1 }
 0x244   :  { %v1162_v40 = vmax.f32 %v1084_v16, %v1130_v56  ;;  %v1437_v1 = vadd.f32 %v1436_v26, %v1435_v39  ;;  %v1438_v28 = vpop.f32.mrb[38].mxu1 }
 0x245   :  { %v1439_v25 = vpop.f32.mrb[39].mxu1 }
 0x246   :  { %v1089_v8 = vadd.f32 %v1437_v1, %v2177_v12  ;;  %v1440_v38 = vadd.f32 %v1439_v25, %v1438_v28  ;;  %v1181_v35 = vpack.c.bf16 %v1162_v40, %v1161_v37 }
 0x248   :  { %v1131_v10 = vmul.f32 0.01, %v1089_v8  ;;  %v1092_v58 = vadd.f32 %v1440_v38, %v2179_v20  ;;  %1457 = vmatprep.subr.bf16.mxu0 %v1181_v35 }
 0x249   :  { %1458 = vmatpush3.bf16.msra.mxu0 %v2185_v29 }
 0x24a   :  { %v1132_v19 = vmul.f32 0.01, %v1092_v58  ;;  %v1441_v59 = vpop.f32.mrb[40].mxu1  ;;  %v1163_v43 = vmax.f32 %v1089_v8, %v1131_v10 }
 0x24b   :  { %v1442_v49 = vpop.f32.mrb[41].mxu1 }
 0x24c   :  { %v1164_v61 = vmax.f32 %v1092_v58, %v1132_v19  ;;  %v1443_v44 = vadd.f32 %v1442_v49, %v1441_v59  ;;  %v1444_v0 = vpop.f32.mrb[42].mxu1 }
 0x24d   :  { %v1445_v21 = vpop.f32.mrb[43].mxu1 }
 0x24e   :  { %v1097_v2 = vadd.f32 %v1443_v44, %v2181_v54  ;;  %v1446_v62 = vadd.f32 %v1445_v21, %v1444_v0  ;;  %v1182_v12 = vpack.c.bf16 %v1164_v61, %v1163_v43 }
 0x250   :  { %v1133_v57 = vmul.f32 0.01, %v1097_v2  ;;  %v1100_v45 = vadd.f32 %v1446_v62, %v2183_v18  ;;  %1459 = vmatprep.subr.bf16.mxu0 %v1182_v12 }
 0x251   :  { %1460 = vmatpush3.bf16.msra.mxu0 %v2191_v31 }
 0x252   :  { %v1134_v20 = vmul.f32 0.01, %v1100_v45  ;;  %v1165_v29 = vmax.f32 %v1097_v2, %v1133_v57 }
 0x254   :  { %v1166_v30 = vmax.f32 %v1100_v45, %v1134_v20 }
 0x256   :  { %v1183_v46 = vpack.c.bf16 %v1166_v30, %v1165_v29 }
 0x258   :  { %1461 = vmatprep.subr.bf16.mxu0 %v1183_v46 }
 0x259   :  { %1462 = vmatpush3.bf16.msra.mxu0 %v2197_v41 }
 0x25c   :  { %1230 = vmatmul.mubr.bf16.vlgmr.msra.gmra.mrb[52].mxu0 %v1316_v6 }
 0x32f   :  { %v1463_v54 = vpop.f32.mrb[52].mxu0 }
 0x330   :  { %v1464_v51 = vpop.f32.mrb[53].mxu0 }
 0x331   :  { %v1465_v18 = vadd.f32 %v1464_v51, %v1463_v54  ;;  %v1466_v36 = vpop.f32.mrb[54].mxu0 }
 0x332   :  { %v1467_v24 = vpop.f32.mrb[55].mxu0 }
 0x333   :  { %v1232_v31 = vadd.f32 %v1465_v18, %v1188_v3 }
 0x335   :  { %1237 = vst.msk [vmem:[#allocation2] sm:$0xff] %vm328_vm1, %v1232_v31 }
 0x336   :  { %1607 = shalt.err (!%p1604_p4)
}
 0x337   :  { %s1608_s26 = scalar_lea.hbm %s2247_s5, 128 }
 0x338   :  { %p1609_p5 = scmp.ne.s32.totalorder %s2247_s5, %s1608_s26  ;;  %p1612_p6 = scmp.lt.u32.totalorder %s1608_s26, %s2247_s5 }
 0x33a   :  { %p1614_p7 = pnand %p1612_p6, %p1609_p5 }
 0x33c   :  { %1617 = shalt.err (!%p1614_p7)
}
 0x33d   :  { %1247 = dma.vmem_to_hbm [thread:$0]  %s1245_s4, 128, %s2247_s5, [#allocation3]  }
 0x33e   :  { %1618 = dma.done.wait [#allocation3], 128  }
 0x33f   :  { %1619 = vsyncadd [#allocation3], 4294967168 }
 0x340   :  { %1251 = vsyncpa [#allocation3], 1 }

</bundles_post_ra>
